<compile_context>
chip_gen: v5e
topology: v5e:2x2
jax: 0.10.0
libtpu: 0.0.40
codegen_flags: <defaults>
</compile_context>

<pallas_src>
import math

import jax
import jax.numpy as jnp
from jax import lax
from jax.experimental import pallas as pl
from jax.experimental.pallas import tpu as pltpu


# ---------------------------------------------------------------------------
# Pallas kernel: one folded-K GEMM per M-tile + bias epilogue (f32 accumulation)
# ---------------------------------------------------------------------------
def _fold_k_gemm_kernel(x_ref, w_ref, b_ref, o_ref):
    # x_ref: (TM, K)     -- im2col tile, K = KH*KW*C folded into the contraction dim
    # w_ref: (K, O_pad)  -- weight, resident across the grid
    # b_ref: (1, O_pad)  -- bias (f32)
    # o_ref: (TM, O_pad) -- lane-dense output tile
    acc = jnp.dot(x_ref[...], w_ref[...], preferred_element_type=jnp.float32)
    o_ref[...] = (acc + b_ref[...]).astype(o_ref.dtype)


def _round_up(x, m):
    return (x + m - 1) // m * m


def _choose_tile_m(M, K, o_pad, in_bytes, out_bytes,
                   vmem_budget=24 * 1024 * 1024):
    """Largest M-tile whose double-buffered working set fits a conservative VMEM
    budget (safe for v7x's 64 MiB physical / 32 MiB scoped default), while keeping
    at least 2 grid steps when the problem allows (megacore sharding + pipelining)."""
    for tm in (2048, 1024, 512, 256, 128):
        if tm > 128 and 2 * tm > M:
            continue  # prefer >= 2 grid steps
        need = (2 * tm * K * in_bytes        # double-buffered x tile
                + 2 * K * o_pad * in_bytes   # weight block (resident)
                + 2 * tm * o_pad * out_bytes)  # double-buffered output tile
        if need <= vmem_budget:
            return tm
    return 128


# ---------------------------------------------------------------------------
# Wrapper: replicates _GFixConvNd.forward for transposed=False, groups=1,
#          padding_mode='zeros' (conv op applies the zero padding itself).
# ---------------------------------------------------------------------------
def gfix_conv2d_forward(x_nchw, weight_oikk, bias_o, *, stride=(1, 1),
                        padding=(1, 1), dilation=(1, 1), compute_dtype=None):
    N, C, H, W = x_nchw.shape
    O, Ci, KH, KW = weight_oikk.shape
    assert Ci == C, "groups=1 only"
    sh, sw = stride
    ph, pw = padding
    dh, dw = dilation

    Ho = (H + 2 * ph - dh * (KH - 1) - 1) // sh + 1
    Wo = (W + 2 * pw - dw * (KW - 1) - 1) // sw + 1
    M = N * Ho * Wo
    K = KH * KW * C
    O_pad = _round_up(O, 128)                 # lane-dense output / weight last dim
    out_dtype = x_nchw.dtype

    # --- glue: NCHW -> NHWC, zero pad, folded-K im2col (taps go into channel dim) ---
    # NOTE: if the surrounding model is channels-last, both transposes can be dropped.
    x_nhwc = jnp.transpose(x_nchw, (0, 2, 3, 1))
    x_p = jnp.pad(x_nhwc, ((0, 0), (ph, ph), (pw, pw), (0, 0)))

    cols = []
    for kh in range(KH):
        for kw in range(KW):
            h0 = kh * dh
            w0 = kw * dw
            patch = x_p[:, h0:h0 + (Ho - 1) * sh + 1:sh,
                        w0:w0 + (Wo - 1) * sw + 1:sw, :]          # (N, Ho, Wo, C)
            cols.append(patch.reshape(M, C))
    x2d = jnp.concatenate(cols, axis=1)                            # (M, K)

    # weight OIHW -> (KH, KW, C, O) -> (K, O) -> pad O to O_pad (tap order matches cols)
    w2d = jnp.transpose(weight_oikk, (2, 3, 1, 0)).reshape(K, O)
    w2d = jnp.pad(w2d, ((0, 0), (0, O_pad - O)))
    b2d = jnp.pad(bias_o.astype(jnp.float32), (0, O_pad - O)).reshape(1, O_pad)

    # Optional low-precision MXU operands (f32 accumulation preserved). Recommended
    # compute_dtype=jnp.bfloat16 on v6e / v7x; keep operands f32 on v5e epilogues.
    if compute_dtype is not None and compute_dtype != x2d.dtype:
        x2d = x2d.astype(compute_dtype)
        w2d = w2d.astype(compute_dtype)

    in_bytes = jnp.dtype(x2d.dtype).itemsize
    out_bytes = jnp.dtype(out_dtype).itemsize

    # --- tile selection: large M-tile, grid = cdiv(M, TM) with zero-padded tail ---
    TM = _choose_tile_m(M, K, O_pad, in_bytes, out_bytes)
    n_tiles = pl.cdiv(M, TM)
    M_pad = n_tiles * TM
    if M_pad != M:
        x2d = jnp.pad(x2d, ((0, M_pad - M), (0, 0)))

    cost = pl.CostEstimate(
        flops=2 * M_pad * K * O_pad,
        transcendentals=0,
        bytes_accessed=int(M_pad * K * in_bytes + K * O_pad * in_bytes
                           + O_pad * 4 + M_pad * O_pad * out_bytes),
    )

    out_flat = pl.pallas_call(
        _fold_k_gemm_kernel,
        out_shape=jax.ShapeDtypeStruct((M_pad, O_pad), out_dtype),
        grid_spec=pltpu.PrefetchScalarGridSpec(
            num_scalar_prefetch=0,
            grid=(n_tiles,),
            in_specs=[
                pl.BlockSpec((TM, K), lambda i: (i, 0)),
                pl.BlockSpec((K, O_pad), lambda i: (0, 0)),
                pl.BlockSpec((1, O_pad), lambda i: (0, 0)),
            ],
            out_specs=pl.BlockSpec((TM, O_pad), lambda i: (i, 0)),
        ),
        compiler_params=pltpu.CompilerParams(
            dimension_semantics=("parallel",),
            vmem_limit_bytes=32 * 1024 * 1024,
        ),
        cost_estimate=cost,
    )(x2d, w2d, b2d)

    # (M_pad, O_pad) -> (M, O) -> (N, Ho, Wo, O) -> NCHW
    out = out_flat[:M, :O].reshape(N, Ho, Wo, O).transpose(0, 3, 1, 2)
    return out


# ---------------------------------------------------------------------------
# Deterministic parameter init, mirroring _GFixConvNd.__init__/reset_parameters:
#   weight: kaiming_uniform_(a=sqrt(5))  =>  U(-1/sqrt(fan_in), 1/sqrt(fan_in))
#   bias:   bias_initializer='zeros' (default) => zeros
# ---------------------------------------------------------------------------
def init_params(key, in_channels, out_channels, kernel_size):
    KH, KW = kernel_size
    fan_in = in_channels * KH * KW
    a = math.sqrt(5.0)
    gain = math.sqrt(2.0 / (1.0 + a * a))
    bound = gain * math.sqrt(3.0 / fan_in)   # == 1/sqrt(fan_in)
    weight = jax.random.uniform(
        key, (out_channels, in_channels, KH, KW),
        minval=-bound, maxval=bound, dtype=jnp.float32)
    bias = jnp.zeros((out_channels,), jnp.float32)
    return weight, bias


if __name__ == "__main__":
    # Module config: in_channels=4, out_channels=8, kernel_size=(3,3), stride=(1,1),
    # padding=1, dilation=(1,1), transposed=False, groups=1, bias=True, padding_mode='zeros'
    key = jax.random.PRNGKey(0)
    kx, kw = jax.random.split(key)

    N, C, H, W = 2, 4, 16, 16
    O, KH, KW = 8, 3, 3

    x = jax.random.normal(kx, (N, C, H, W), dtype=jnp.float32)
    weight, bias = init_params(kw, C, O, (KH, KW))

    # Reference (pure XLA) forward semantics: F.conv2d(x, W, b, stride=1, padding=1)
    ref = lax.conv_general_dilated(
        x, weight, window_strides=(1, 1), padding=((1, 1), (1, 1)),
        rhs_dilation=(1, 1),
        dimension_numbers=("NCHW", "OIHW", "NCHW")) + bias.reshape(1, O, 1, 1)

    # f32 path (exact check)
    out = gfix_conv2d_forward(x, weight, bias,
                              stride=(1, 1), padding=(1, 1), dilation=(1, 1))
    out = jax.block_until_ready(out)
    assert out.shape == (N, O, H, W), out.shape
    assert jnp.allclose(out, ref, atol=1e-4, rtol=1e-4), \
        float(jnp.max(jnp.abs(out - ref)))

    # bf16-operand path (v6e/v7x MXU peak; f32 accumulation) -- loose tolerance
    out_bf16 = gfix_conv2d_forward(x, weight, bias,
                                   stride=(1, 1), padding=(1, 1), dilation=(1, 1),
                                   compute_dtype=jnp.bfloat16)
    out_bf16 = jax.block_until_ready(out_bf16)
    assert jnp.allclose(out_bf16, ref, atol=5e-2, rtol=5e-2), \
        float(jnp.max(jnp.abs(out_bf16 - ref)))

    print("KERNEL_OK")
</pallas_src>

<mosaic_0001>
module attributes {stable_mosaic.version = 11 : i64} {
  func.func @_fold_k_gemm_kernel(%arg0: i32, %arg1: memref<256x36xf32, #tpu.memory_space<vmem>>, %arg2: memref<36x128xf32, #tpu.memory_space<vmem>>, %arg3: memref<1x128xf32, #tpu.memory_space<vmem>>, %arg4: memref<256x128xf32, #tpu.memory_space<vmem>>) attributes {dimension_semantics = [#tpu.dimension_semantics<parallel>], iteration_bounds = array<i64: 2>, scalar_prefetch = 0 : i64, scratch_operands = 0 : i64, tpu.core_type = #tpu.core_type<tc>, window_params = [{transform_indices = @transform_0, window_bounds = array<i64: 256, 36>}, {pipeline_mode = #tpu.pipeline_mode<synchronous>, transform_indices = @transform_1, window_bounds = array<i64: 36, 128>}, {pipeline_mode = #tpu.pipeline_mode<synchronous>, transform_indices = @transform_2, window_bounds = array<i64: 1, 128>}, {transform_indices = @transform_3, window_bounds = array<i64: 256, 128>}]} {
    %c0 = arith.constant 0 : index
    %c0_0 = arith.constant 0 : index
    %0 = vector.load %arg1[%c0, %c0_0] : memref<256x36xf32, #tpu.memory_space<vmem>>, vector<256x36xf32>
    %c0_1 = arith.constant 0 : index
    %c0_2 = arith.constant 0 : index
    %1 = vector.load %arg2[%c0_1, %c0_2] : memref<36x128xf32, #tpu.memory_space<vmem>>, vector<36x128xf32>
    %cst = arith.constant dense<0.000000e+00> : vector<256x128xf32>
    %2 = tpu.matmul %0, %1, %cst {dimension_numbers = #tpu.dot_dimension_numbers<[1], [0], [0], [1], [0, 0, 1, 1], [], []>} : vector<256x36xf32>, vector<36x128xf32>, vector<256x128xf32> -> vector<256x128xf32>
    %c0_3 = arith.constant 0 : index
    %c0_4 = arith.constant 0 : index
    %3 = vector.load %arg3[%c0_3, %c0_4] : memref<1x128xf32, #tpu.memory_space<vmem>>, vector<1x128xf32>
    %4 = vector.broadcast %3 : vector<1x128xf32> to vector<256x128xf32>
    %5 = arith.addf %2, %4 : vector<256x128xf32>
    %c0_5 = arith.constant 0 : index
    %c0_6 = arith.constant 0 : index
    %6 = vector.load %arg4[%c0_5, %c0_6] : memref<256x128xf32, #tpu.memory_space<vmem>>, vector<256x128xf32>
    tpu.vector_store %arg4[%c0_5, %c0_6], %5 {strides = array<i32>} : memref<256x128xf32, #tpu.memory_space<vmem>>, vector<256x128xf32>,
    return
  }
  func.func @transform_0(%arg0: i32) -> (i32, i32) {
    %c0_i32 = arith.constant 0 : i32
    %c0_i32_0 = arith.constant 0 : i32
    return %arg0, %c0_i32 : i32, i32
  }
  func.func @transform_1(%arg0: i32) -> (i32, i32) {
    %c0_i32 = arith.constant 0 : i32
    %c0_i32_0 = arith.constant 0 : i32
    %c0_i32_1 = arith.constant 0 : i32
    return %c0_i32, %c0_i32_0 : i32, i32
  }
  func.func @transform_2(%arg0: i32) -> (i32, i32) {
    %c0_i32 = arith.constant 0 : i32
    %c0_i32_0 = arith.constant 0 : i32
    %c0_i32_1 = arith.constant 0 : i32
    return %c0_i32, %c0_i32_0 : i32, i32
  }
  func.func @transform_3(%arg0: i32) -> (i32, i32) {
    %c0_i32 = arith.constant 0 : i32
    %c0_i32_0 = arith.constant 0 : i32
    return %arg0, %c0_i32 : i32, i32
  }
}

</mosaic_0001>

<bundles_post_ra>
// kernel: tpu_custom_call.1
= control target key start
LH: loop header
LB: loop body
LE: loop exit
PB: predicated region body
PF: predicated region fallthrough
CT: control target
= control target key end

     0   :  { %8 = vsyncpa [#allocation3], 0  ;;  %s967_s0 = inlined_call_operand.vmem [shape: f32[512,36], index: 0, kind: input, shape index: {}]   ;;  %s968_s1 = inlined_call_operand.vmem [shape: f32[36,128], index: 1, kind: input, shape index: {}]   ;;  %s969_s2 = inlined_call_operand.vmem [shape: f32[1,128], index: 2, kind: input, shape index: {}]   ;;  %s970_s3 = inlined_call_operand.hbm [shape: f32[512,128], index: 3, kind: output, shape index: {}]  }
   0x1   :  { %10 = vsyncpa [#allocation3 + $0x1], 0  ;;  %s726_s12 = smov 0   ;;  %s728_s13 = smov 0  }
   0x2   :  { %s730_s14 = smov 0   ;;  %s732_s15 = smov 0  }
   0x3 LB: > { %s747_s16 = sadd.s32 4294967295, %s702_s15   ;;  %s537_s17 = sadd.s32 4294967294, %s702_s15   ;;  %s702_s15 = sphi %s732_s15, %s976_s15   ;;  %s698_s14 = sphi %s730_s14, %s975_s14   ;;  %s694_s13 = sphi %s728_s13, %s974_s13   ;;  %s690_s12 = sphi %s726_s12, %s973_s12  }
   0x4   : > { %s751_s18 = sadd.s32 1, %s702_s15   ;;  %s91_s19 = sadd.s32 1, %s698_s14 }
   0x5   : > { %s88_s20 = ssub.s32 %s702_s15, %s751_s18  ;;  %p101_p0 = scmp.ne.s32.totalorder %s698_s14, %s694_s13 }
   0x6   : > { %p89_p1 = scmp.eq.s32.totalorder %s88_s20, 0  ;;  %p102_p2 = scmp.eq.s32.totalorder %s747_s16, 1 }
   0x7   : > { %p107_p3 = scmp.ne.s32.totalorder %s694_s13, %s690_s12  ;;  %p108_p4 = scmp.eq.s32.totalorder %s537_s17, 1 }
   0x8   : > { %s762_s21 = scalar_select %p89_p1, %s698_s14, %s91_s19  }
   0x9   : > { %p764_p5 = por %p102_p2, %p101_p0  ;;  %p768_p6 = por %p108_p4, %p107_p3 }
   0xa   : > { %p540_p7 = scmp.ge.s32.totalorder %s702_s15, 1  ;;  %p141_p8 = scmp.lt.s32.totalorder %s702_s15, 3 }
   0xc   : > { %p142_p9 = pnand %p540_p7, %p141_p8 }
   0xd   : > { %s542_s28 = sshll.u32 (!%p142_p9), %s747_s16, 5  ;;  %s162_s17 = sand.u32 (!%p142_p9), 1, %s694_s13  }
   0xe   : > { %145 = sbr.rel (%p142_p9) target bundleno = 224 (0xe0), region = 32  ;;  %p166_p10 = scmp.lt.s32.totalorder (!%p142_p9), %s542_s28, 63 }
   0xf   : > { %s541_s19 = sshll.u32 (!%p142_p9), %s162_s17, 8  ;;  %s582_s26 = sshll.u32 (!%p142_p9), %s747_s16, 8 }
  0x10   : > { %s869_s25 = scalar_lea.vmem (!%p142_p9), [#allocation2], %s541_s19  ;;  %s471_s29 = scalar_lea.hbm (!%p142_p9), %s970_s3, %s582_s26 }
  0x11   : > { %s472_s16 = sshll.u32 (!%p142_p9), %s869_s25, 4  ;;  %s474_s30 = sshll.u32 (!%p142_p9), %s471_s29, 4  ;;  %s473_s16 = int_to_ptr.vmem [resolvable:$true] %s472_s16  ;;  %s475_s30 = int_to_ptr.hbm [resolvable:$true] %s474_s30 }
  0x12   : > { %s460_s4 = scalar_lea.sflag (!%p142_p9), [#allocation3], %s162_s17  ;;  %s654_s5 = sshra.s32 (!%p142_p9), %s475_s30, 4  ;;  %s655_s5 = int_to_ptr.hbm [resolvable:$true] %s654_s5 }
  0x13   : > { %v208_v0 = vld [vmem:[%s968_s1 + $0x20] sm:$0xf]  ;;  %vm310_vm0 = vcmask 1043456   ;;  %v207_v1 = vld [vmem:[%s968_s1 + $0x18] sm:$0xff]  ;;  %v206_v2 = vld [vmem:[%s968_s1 + $0x10] sm:$0xff]  ;;  %s978_s28 = smov (!%p166_p10, %s542_s28), 63  ;;  %p661_p0 = scmp.lt.s32.totalorder %s655_s5, %s970_s3 }
  0x14   : > { %584 = vmatpush.msk.msra.mxu2 %vm310_vm0, %v208_v0  ;;  %585 = vmatpush.msk.msra.mxu3 %vm310_vm0, %v208_v0  ;;  %v205_v3 = vld [vmem:[%s968_s1 + $0x8] sm:$0xff]  ;;  %s543_s6 = sshll.u32 %s978_s28, 3  ;;  %v204_v4 = vld [vmem:[%s968_s1] sm:$0xff]  ;;  %vm213_vm1 = vcmask 293888   ;;  %s660_s9 = scalar_lea.hbm %s970_s3, 512 }
  0x15   : > { %544 = vmatpush.msk.msra.mxu0 %vm310_vm0, %v208_v0  ;;  %583 = vmatpush.msk.msra.mxu1 %vm310_vm0, %v208_v0  ;;  %s793_s11 = scalar_lea.vmem %s967_s0, %s543_s6  ;;  %v865_v37 = vld [vmem:[%s969_s2] ss:$0 sm:$0xff]  ;;  %s656_s6 = scalar_lea.hbm %s655_s5, 256 }
  0x16   : > { %587 = vmatpush.msra.mxu2 %v207_v1  ;;  %588 = vmatpush.msra.mxu3 %v207_v1  ;;  %v188_v5 = vld [vmem:[%s793_s11 + $0x80] sm:$0xff]  ;;  %v189_v9 = vld [vmem:[%s793_s11 + $0x88] sm:$0xff]  ;;  %v190_v13 = vld [vmem:[%s793_s11 + $0x90] sm:$0xff]  ;;  %p657_p11 = scmp.ne.s32.totalorder %s655_s5, %s656_s6  ;;  %p662_p1 = scmp.lt.s32.totalorder %s660_s9, %s656_s6 }
  0x17   : > { %326 = vmatpush.msra.mxu0 %v207_v1  ;;  %586 = vmatpush.msra.mxu1 %v207_v1  ;;  %v196_v6 = vld [vmem:[%s793_s11 + $0xc0] sm:$0xff]  ;;  %v197_v10 = vld [vmem:[%s793_s11 + $0xc8] sm:$0xff]  ;;  %v198_v14 = vld [vmem:[%s793_s11 + $0xd0] sm:$0xff] }
  0x18   : > { %590 = vmatpush.msra.mxu2 %v206_v2  ;;  %591 = vmatpush.msra.mxu3 %v206_v2  ;;  %v172_v7 = vld [vmem:[%s793_s11] sm:$0xff]  ;;  %v173_v11 = vld [vmem:[%s793_s11 + $0x8] sm:$0xff]  ;;  %v174_v15 = vld [vmem:[%s793_s11 + $0x10] sm:$0xff]  ;;  %p658_p12 = pnand %p657_p11, %p764_p5  ;;  %p663_p2 = por %p662_p1, %p661_p0 }
  0x19   : > { %327 = vmatpush.msra.mxu0 %v206_v2  ;;  %589 = vmatpush.msra.mxu1 %v206_v2  ;;  %v180_v8 = vld [vmem:[%s793_s11 + $0x40] sm:$0xff]  ;;  %v181_v12 = vld [vmem:[%s793_s11 + $0x48] sm:$0xff]  ;;  %v182_v16 = vld [vmem:[%s793_s11 + $0x50] sm:$0xff] }
  0x1a   : > { %593 = vmatpush.msra.mxu2 %v205_v3  ;;  %594 = vmatpush.msra.mxu3 %v205_v3  ;;  %v191_v17 = vld [vmem:[%s793_s11 + $0x98] sm:$0xff]  ;;  %v192_v21 = vld [vmem:[%s793_s11 + $0xa0] sm:$0xff]  ;;  %v193_v25 = vld [vmem:[%s793_s11 + $0xa8] sm:$0xff]  ;;  %p659_p13 = pneg %p658_p12 }
  0x1b   : > { %328 = vmatpush.msra.mxu0 %v205_v3  ;;  %592 = vmatpush.msra.mxu1 %v205_v3  ;;  %v199_v18 = vld [vmem:[%s793_s11 + $0xd8] sm:$0xff]  ;;  %v200_v22 = vld [vmem:[%s793_s11 + $0xe0] sm:$0xff]  ;;  %v201_v26 = vld [vmem:[%s793_s11 + $0xe8] sm:$0xff] }
  0x1c   : > { %596 = vmatpush.msra.mxu2 %v204_v4  ;;  %597 = vmatpush.msra.mxu3 %v204_v4  ;;  %v175_v19 = vld [vmem:[%s793_s11 + $0x18] sm:$0xff]  ;;  %v176_v23 = vld [vmem:[%s793_s11 + $0x20] sm:$0xff]  ;;  %v177_v27 = vld [vmem:[%s793_s11 + $0x28] sm:$0xff]  ;;  %p664_p3 = pnand %p663_p2, %p659_p13 }
  0x1d   : > { %561 = vmatmul.msk.f32.vlgmr.msra.gmra.mxu2 %vm213_vm1, %v188_v5  ;;  %569 = vmatmul.msk.f32.vlgmr.msra.gmra.mxu3 %vm213_vm1, %v196_v6  ;;  %v183_v20 = vld [vmem:[%s793_s11 + $0x58] sm:$0xff]  ;;  %v184_v24 = vld [vmem:[%s793_s11 + $0x60] sm:$0xff]  ;;  %v185_v28 = vld [vmem:[%s793_s11 + $0x68] sm:$0xff] }
  0x1e   : > { %329 = vmatpush.msra.mxu0 %v204_v4  ;;  %595 = vmatpush.msra.mxu1 %v204_v4  ;;  %v194_v29 = vld [vmem:[%s793_s11 + $0xb0] sm:$0xff]  ;;  %v195_v33 = vld [vmem:[%s793_s11 + $0xb8] sm:$0xff] }
  0x1f   : > { %545 = vmatmul.msk.f32.vlgmr.msra.gmra.mxu0 %vm213_vm1, %v172_v7  ;;  %553 = vmatmul.msk.f32.vlgmr.msra.gmra.mxu1 %vm213_vm1, %v180_v8  ;;  %v202_v30 = vld [vmem:[%s793_s11 + $0xf0] sm:$0xff]  ;;  %v203_v34 = vld [vmem:[%s793_s11 + $0xf8] sm:$0xff] }
  0x20   : > { %v178_v31 = vld [vmem:[%s793_s11 + $0x30] sm:$0xff]  ;;  %v179_v35 = vld [vmem:[%s793_s11 + $0x38] sm:$0xff] }
  0x21   : > { %v186_v32 = vld [vmem:[%s793_s11 + $0x70] sm:$0xff]  ;;  %v187_v36 = vld [vmem:[%s793_s11 + $0x78] sm:$0xff] }
  0x25   : > { %562 = vmatmul.msk.f32.gmra.mxu2 %vm213_vm1, %v189_v9  ;;  %570 = vmatmul.msk.f32.gmra.mxu3 %vm213_vm1, %v197_v10 }
  0x27   : > { %546 = vmatmul.msk.f32.gmra.mxu0 %vm213_vm1, %v173_v11  ;;  %554 = vmatmul.msk.f32.gmra.mxu1 %vm213_vm1, %v181_v12 }
  0x2d   : > { %563 = vmatmul.msk.f32.gmra.mxu2 %vm213_vm1, %v190_v13  ;;  %571 = vmatmul.msk.f32.gmra.mxu3 %vm213_vm1, %v198_v14 }
  0x2f   : > { %547 = vmatmul.msk.f32.gmra.mxu0 %vm213_vm1, %v174_v15  ;;  %555 = vmatmul.msk.f32.gmra.mxu1 %vm213_vm1, %v182_v16 }
  0x35   : > { %564 = vmatmul.msk.f32.gmra.mxu2 %vm213_vm1, %v191_v17  ;;  %572 = vmatmul.msk.f32.gmra.mxu3 %vm213_vm1, %v199_v18 }
  0x37   : > { %548 = vmatmul.msk.f32.gmra.mxu0 %vm213_vm1, %v175_v19  ;;  %556 = vmatmul.msk.f32.gmra.mxu1 %vm213_vm1, %v183_v20 }
  0x3d   : > { %565 = vmatmul.msk.f32.gmra.mxu2 %vm213_vm1, %v192_v21  ;;  %573 = vmatmul.msk.f32.gmra.mxu3 %vm213_vm1, %v200_v22 }
  0x3f   : > { %549 = vmatmul.msk.f32.gmra.mxu0 %vm213_vm1, %v176_v23  ;;  %557 = vmatmul.msk.f32.gmra.mxu1 %vm213_vm1, %v184_v24 }
  0x45   : > { %566 = vmatmul.msk.f32.gmra.mxu2 %vm213_vm1, %v193_v25  ;;  %574 = vmatmul.msk.f32.gmra.mxu3 %vm213_vm1, %v201_v26 }
  0x47   : > { %550 = vmatmul.msk.f32.gmra.mxu0 %vm213_vm1, %v177_v27  ;;  %558 = vmatmul.msk.f32.gmra.mxu1 %vm213_vm1, %v185_v28 }
  0x4d   : > { %567 = vmatmul.msk.f32.gmra.mxu2 %vm213_vm1, %v194_v29  ;;  %575 = vmatmul.msk.f32.gmra.mxu3 %vm213_vm1, %v202_v30 }
  0x4f   : > { %551 = vmatmul.msk.f32.gmra.mxu0 %vm213_vm1, %v178_v31  ;;  %559 = vmatmul.msk.f32.gmra.mxu1 %vm213_vm1, %v186_v32 }
  0x55   : > { %568 = vmatmul.msk.f32.gmra.mxu2 %vm213_vm1, %v195_v33  ;;  %576 = vmatmul.msk.f32.gmra.mxu3 %vm213_vm1, %v203_v34 }
  0x57   : > { %552 = vmatmul.msk.f32.gmra.mxu0 %vm213_vm1, %v179_v35  ;;  %560 = vmatmul.msk.f32.gmra.mxu1 %vm213_vm1, %v187_v36 }
  0x9c   : > { %v331_v38 = vpop.f32.mrf.mxu0  ;;  %v355_v39 = vpop.f32.mrf.mxu1 }
  0x9d   : > { %v332_v40 = vadd.f32 %v865_v37, %v331_v38  ;;  %v356_v41 = vadd.f32 %v865_v37, %v355_v39 }
  0x9f   : > { %427 = vst [vmem:[%s869_s25] sm:$0xff] %v332_v40 }
  0xa0   : > { %435 = vst [vmem:[%s869_s25 + $0x40] sm:$0xff] %v356_v41  ;;  %v379_v42 = vpop.f32.mrf.mxu2  ;;  %v403_v43 = vpop.f32.mrf.mxu3 }
  0xa1   : > { %v380_v44 = vadd.f32 %v865_v37, %v379_v42  ;;  %v404_v45 = vadd.f32 %v865_v37, %v403_v43 }
  0xa3   : > { %443 = vst [vmem:[%s869_s25 + $0x80] sm:$0xff] %v380_v44 }
  0xa4   : > { %451 = vst [vmem:[%s869_s25 + $0xc0] sm:$0xff] %v404_v45  ;;  %v334_v46 = vpop.f32.mrf.mxu0  ;;  %v358_v47 = vpop.f32.mrf.mxu1 }
  0xa5   : > { %v335_v48 = vadd.f32 %v865_v37, %v334_v46  ;;  %v359_v49 = vadd.f32 %v865_v37, %v358_v47 }
  0xa7   : > { %428 = vst [vmem:[%s869_s25 + $0x8] sm:$0xff] %v335_v48 }
  0xa8   : > { %436 = vst [vmem:[%s869_s25 + $0x48] sm:$0xff] %v359_v49  ;;  %v382_v50 = vpop.f32.mrf.mxu2  ;;  %v406_v51 = vpop.f32.mrf.mxu3 }
  0xa9   : > { %v383_v52 = vadd.f32 %v865_v37, %v382_v50  ;;  %v407_v53 = vadd.f32 %v865_v37, %v406_v51 }
  0xab   : > { %444 = vst [vmem:[%s869_s25 + $0x88] sm:$0xff] %v383_v52 }
  0xac   : > { %452 = vst [vmem:[%s869_s25 + $0xc8] sm:$0xff] %v407_v53  ;;  %v337_v54 = vpop.f32.mrf.mxu0  ;;  %v361_v55 = vpop.f32.mrf.mxu1 }
  0xad   : > { %v338_v56 = vadd.f32 %v865_v37, %v337_v54  ;;  %v362_v57 = vadd.f32 %v865_v37, %v361_v55 }
  0xaf   : > { %429 = vst [vmem:[%s869_s25 + $0x10] sm:$0xff] %v338_v56 }
  0xb0   : > { %437 = vst [vmem:[%s869_s25 + $0x50] sm:$0xff] %v362_v57  ;;  %v385_v58 = vpop.f32.mrf.mxu2  ;;  %v409_v59 = vpop.f32.mrf.mxu3 }
  0xb1   : > { %v386_v60 = vadd.f32 %v865_v37, %v385_v58  ;;  %v410_v61 = vadd.f32 %v865_v37, %v409_v59 }
  0xb3   : > { %445 = vst [vmem:[%s869_s25 + $0x90] sm:$0xff] %v386_v60 }
  0xb4   : > { %453 = vst [vmem:[%s869_s25 + $0xd0] sm:$0xff] %v410_v61  ;;  %v340_v62 = vpop.f32.mrf.mxu0  ;;  %v364_v63 = vpop.f32.mrf.mxu1 }
  0xb5   : > { %v341_v0 = vadd.f32 %v865_v37, %v340_v62  ;;  %v365_v1 = vadd.f32 %v865_v37, %v364_v63 }
  0xb7   : > { %430 = vst [vmem:[%s869_s25 + $0x18] sm:$0xff] %v341_v0 }
  0xb8   : > { %438 = vst [vmem:[%s869_s25 + $0x58] sm:$0xff] %v365_v1  ;;  %v388_v2 = vpop.f32.mrf.mxu2  ;;  %v412_v3 = vpop.f32.mrf.mxu3 }
  0xb9   : > { %v389_v4 = vadd.f32 %v865_v37, %v388_v2  ;;  %v413_v5 = vadd.f32 %v865_v37, %v412_v3 }
  0xbb   : > { %446 = vst [vmem:[%s869_s25 + $0x98] sm:$0xff] %v389_v4 }
  0xbc   : > { %454 = vst [vmem:[%s869_s25 + $0xd8] sm:$0xff] %v413_v5  ;;  %v343_v6 = vpop.f32.mrf.mxu0  ;;  %v367_v7 = vpop.f32.mrf.mxu1 }
  0xbd   : > { %v344_v8 = vadd.f32 %v865_v37, %v343_v6  ;;  %v368_v9 = vadd.f32 %v865_v37, %v367_v7 }
  0xbf   : > { %431 = vst [vmem:[%s869_s25 + $0x20] sm:$0xff] %v344_v8 }
  0xc0   : > { %439 = vst [vmem:[%s869_s25 + $0x60] sm:$0xff] %v368_v9  ;;  %v391_v10 = vpop.f32.mrf.mxu2  ;;  %v415_v11 = vpop.f32.mrf.mxu3 }
  0xc1   : > { %v392_v12 = vadd.f32 %v865_v37, %v391_v10  ;;  %v416_v13 = vadd.f32 %v865_v37, %v415_v11 }
  0xc3   : > { %447 = vst [vmem:[%s869_s25 + $0xa0] sm:$0xff] %v392_v12 }
  0xc4   : > { %455 = vst [vmem:[%s869_s25 + $0xe0] sm:$0xff] %v416_v13  ;;  %v346_v14 = vpop.f32.mrf.mxu0  ;;  %v370_v15 = vpop.f32.mrf.mxu1 }
  0xc5   : > { %v347_v16 = vadd.f32 %v865_v37, %v346_v14  ;;  %v371_v17 = vadd.f32 %v865_v37, %v370_v15 }
  0xc7   : > { %432 = vst [vmem:[%s869_s25 + $0x28] sm:$0xff] %v347_v16 }
  0xc8   : > { %440 = vst [vmem:[%s869_s25 + $0x68] sm:$0xff] %v371_v17  ;;  %v394_v18 = vpop.f32.mrf.mxu2  ;;  %v418_v19 = vpop.f32.mrf.mxu3 }
  0xc9   : > { %v395_v20 = vadd.f32 %v865_v37, %v394_v18  ;;  %v419_v21 = vadd.f32 %v865_v37, %v418_v19 }
  0xcb   : > { %448 = vst [vmem:[%s869_s25 + $0xa8] sm:$0xff] %v395_v20 }
  0xcc   : > { %456 = vst [vmem:[%s869_s25 + $0xe8] sm:$0xff] %v419_v21  ;;  %v349_v22 = vpop.f32.mrf.mxu0  ;;  %v373_v23 = vpop.f32.mrf.mxu1 }
  0xcd   : > { %v350_v24 = vadd.f32 %v865_v37, %v349_v22  ;;  %v374_v25 = vadd.f32 %v865_v37, %v373_v23 }
  0xcf   : > { %433 = vst [vmem:[%s869_s25 + $0x30] sm:$0xff] %v350_v24 }
  0xd0   : > { %441 = vst [vmem:[%s869_s25 + $0x70] sm:$0xff] %v374_v25  ;;  %v397_v26 = vpop.f32.mrf.mxu2  ;;  %v421_v27 = vpop.f32.mrf.mxu3 }
  0xd1   : > { %v398_v28 = vadd.f32 %v865_v37, %v397_v26  ;;  %v422_v29 = vadd.f32 %v865_v37, %v421_v27 }
  0xd3   : > { %449 = vst [vmem:[%s869_s25 + $0xb0] sm:$0xff] %v398_v28 }
  0xd4   : > { %457 = vst [vmem:[%s869_s25 + $0xf0] sm:$0xff] %v422_v29  ;;  %v352_v30 = vpop.f32.mrf.mxu0  ;;  %v376_v31 = vpop.f32.mrf.mxu1 }
  0xd5   : > { %v353_v32 = vadd.f32 %v865_v37, %v352_v30  ;;  %v377_v33 = vadd.f32 %v865_v37, %v376_v31 }
  0xd7   : > { %434 = vst [vmem:[%s869_s25 + $0x38] sm:$0xff] %v353_v32 }
  0xd8   : > { %442 = vst [vmem:[%s869_s25 + $0x78] sm:$0xff] %v377_v33  ;;  %v400_v34 = vpop.f32.mrf.mxu2  ;;  %v424_v35 = vpop.f32.mrf.mxu3 }
  0xd9   : > { %v401_v36 = vadd.f32 %v865_v37, %v400_v34  ;;  %v425_v38 = vadd.f32 %v865_v37, %v424_v35 }
  0xdb   : > { %450 = vst [vmem:[%s869_s25 + $0xb8] sm:$0xff] %v401_v36 }
  0xdc   : > { %458 = vst [vmem:[%s869_s25 + $0xf8] sm:$0xff] %v425_v38 }
  0xdd   : > { %667 = shalt.err (!%p664_p3)
}
  0xde   : > { %s704_s17 = smov 128   ;;  %s705_s19 = smov 8  }
  0xdf   : > { %598 = dma.vmem_to_hbm [thread:$0]  (%p764_p5), %s473_s16, 4096, %s475_s30, %s460_s4, %s704_s17, %s704_s17, %s705_s19  }
  0xe0 PF: > { %p604_p4 = scmp.ge.s32.totalorder %s702_s15, 2  ;;  %s489_s20 = sand.u32 1, %s690_s12  }
  0xe1   : > { %s490_s24 = scalar_lea.sflag [#allocation3], %s489_s20 }
  0xe2   : > { %p601_p7 = pnand %p604_p4, %p768_p6 }
  0xe4   : > { %p602_p8 = pneg %p601_p7 }
  0xe6   : > { %685 = dma.done.wait (%p602_p8), %s490_s24, 4096  }
  0xe7   : > { %687 = vsyncadd (%p602_p8), %s490_s24, 4294963200  ;;  %p13_p9 = scmp.ge.s32.totalorder %s751_s18, 4   ;;  %s973_s12 = smov %s694_s13 }
  0xe8   : > { %s974_s13 = smov %s698_s14  ;;  %s975_s14 = smov %s762_s21 }
  0xe9   : > { %s976_s15 = smov %s751_s18  ;;  %15 = sbr.rel (!%p13_p9) target bundleno = 3 (0x3), region = 67 }
  0xee   :  { %496 = vsyncpa [#allocation3], 1 }
  0xef   :  { %498 = vsyncpa [#allocation3 + $0x1], 1 }

</bundles_post_ra>
